<compile_context>
chip_gen: v6e
topology: v6e:2x2x1
jax: 0.10.0
libtpu: 0.0.40
codegen_flags: <defaults>
</compile_context>

<pallas_src>
import jax
import jax.numpy as jnp
from jax.experimental import pallas as pl
from jax.experimental.pallas import tpu as pltpu


def _round_up(x, m):
    return (x + m - 1) // m * m


def _num_tensorcores_per_chip():
    # v7x (and v3/v4 megacore) expose 2 TensorCores per chip; v5e/v6e have 1.
    try:
        kind = jax.devices()[0].device_kind.lower()
    except Exception:
        return 1
    return 2 if any(t in kind for t in ("v7", "7x", "v4", "v3")) else 1


def _k1_vmem_est(tm, H, tv):
    # double-buffered hidden / weight / bf16-logits blocks + f32 logits intermediate
    # + bias blocks + scratch
    return (2 * tm * H * 2 + 2 * H * tv * 2 + 2 * tm * tv * 2
            + tm * tv * 4 + 2 * tv * 4 + 4 * tm * 8)


def _pick_tm(M, H, tv, n_cores, budget=28 << 20):
    M8 = _round_up(M, 8)
    if n_cores > 1:
        # exactly one M tile per TensorCore (v7x): weight streamed n_cores times,
        # both cores busy.
        desired = _round_up(-(-M8 // n_cores), 256)
    else:
        # single-TC chips (v5e/v6e): whole B*S in one tile -> weight streamed once.
        desired = M8
    tm = max(8, min(desired, M8))
    while tm > 256 and _k1_vmem_est(tm, H, tv) > budget:
        tm = _round_up(tm // 2, 256)
    return tm


# ---------------------------------------------------------------------------
# Init-time weight preprocessing (hoisted out of the per-forward hot path):
# pad vocab to a tv multiple, cast to bf16, tile-major [nv, H, tv] layout, and
# bias = -1e30 on padded columns so they can never win the argmax.
# ---------------------------------------------------------------------------
def prepare_dense_params(w, bias, tv_max=1024):
    H, V = w.shape
    tv = min(tv_max, _round_up(V, 128))
    V_pad = _round_up(V, tv)
    nv = V_pad // tv
    w_p = jnp.zeros((H, V_pad), jnp.bfloat16).at[:, :V].set(w.astype(jnp.bfloat16))
    w_tiles = w_p.reshape(H, nv, tv).transpose(1, 0, 2)            # [nv, H, tv]
    b_p = jnp.full((V_pad,), -1e30, jnp.float32).at[:V].set(bias.astype(jnp.float32))
    return {"w_tiles": w_tiles, "b_p": b_p.reshape(1, V_pad),
            "V": V, "V_pad": V_pad, "tv": tv}


# ---------------------------------------------------------------------------
# Kernel 1: fused dense (bf16 logits out) + running argmax over vocab tiles.
#   grid = (M tiles [parallel], V tiles [arbitrary, innermost])
# ---------------------------------------------------------------------------
def _logits_argmax_kernel(h_ref, w_ref, b_ref, logits_ref, pred_ref, m_sc, a_sc):
    vi = pl.program_id(1)
    tv = logits_ref.shape[-1]

    # logits tile = (h @ W_tile) + bias_tile   (bf16 inputs, f32 accumulation)
    logits = jnp.dot(h_ref[...], w_ref[0],
                     preferred_element_type=jnp.float32) + b_ref[...]
    logits_ref[...] = logits.astype(logits_ref.dtype)   # bf16 store halves logits HBM stream

    # running argmax across vocab tiles (vocab axis is innermost / "arbitrary")
    @pl.when(vi == 0)
    def _():
        m_sc[...] = jnp.full(m_sc.shape, -jnp.inf, dtype=m_sc.dtype)
        a_sc[...] = jnp.zeros(a_sc.shape, dtype=a_sc.dtype)

    tile_max = jnp.max(logits, axis=-1, keepdims=True)                 # (tm, 1)
    lane_idx = jax.lax.broadcasted_iota(jnp.int32, logits.shape, 1)
    big = jnp.iinfo(jnp.int32).max
    # min lane index among maxima -> first-occurrence tie-break inside a tile
    tile_arg = jnp.min(jnp.where(logits == tile_max, lane_idx, big),
                       axis=-1, keepdims=True) + vi * tv               # global id

    take_new = tile_max > m_sc[...]   # strict '>' keeps first occurrence across tiles
    a_sc[...] = jnp.where(take_new, tile_arg, a_sc[...])
    m_sc[...] = jnp.where(take_new, tile_max, m_sc[...])

    @pl.when(vi == pl.num_programs(1) - 1)
    def _():
        pred_ref[...] = a_sc[...]


def _dense_logits_argmax(h, dense_params):
    """h: [M, H] f32 -> (padded logits [M_pad, V_pad] bf16, pred [M] i32)."""
    M, H = h.shape
    w_tiles, b_p = dense_params["w_tiles"], dense_params["b_p"]
    tv, V_pad = dense_params["tv"], dense_params["V_pad"]
    nv = V_pad // tv

    n_cores = _num_tensorcores_per_chip()
    tm = _pick_tm(M, H, tv, n_cores)
    M_pad = _round_up(M, tm)

    h_bf = h.astype(jnp.bfloat16)
    if M_pad > M:
        h_bf = jnp.zeros((M_pad, H), jnp.bfloat16).at[:M].set(h_bf)

    vmem_limit = int(min(max(_k1_vmem_est(tm, H, tv) + (8 << 20), 32 << 20), 48 << 20))

    grid_spec = pltpu.PrefetchScalarGridSpec(
        num_scalar_prefetch=0,
        grid=(M_pad // tm, nv),
        in_specs=[
            pl.BlockSpec((tm, H), lambda m, v: (m, 0)),          # hidden (bf16)
            pl.BlockSpec((1, H, tv), lambda m, v: (v, 0, 0)),    # contiguous W tile
            pl.BlockSpec((1, tv), lambda m, v: (0, v)),          # bias tile
        ],
        out_specs=(
            pl.BlockSpec((tm, tv), lambda m, v: (m, v)),         # bf16 logits
            pl.BlockSpec((tm, 1), lambda m, v: (m, 0)),          # argmax ids (acc)
        ),
        scratch_shapes=[
            pltpu.VMEM((tm, 1), jnp.float32),                    # running max
            pltpu.VMEM((tm, 1), jnp.int32),                      # running argmax
        ],
    )
    logits_p, pred_p = pl.pallas_call(
        _logits_argmax_kernel,
        out_shape=(
            jax.ShapeDtypeStruct((M_pad, V_pad), jnp.bfloat16),
            jax.ShapeDtypeStruct((M_pad, 1), jnp.int32),
        ),
        grid_spec=grid_spec,
        compiler_params=pltpu.CompilerParams(
            dimension_semantics=("parallel", "arbitrary"),
            vmem_limit_bytes=vmem_limit),
    )(h_bf, w_tiles, b_p)
    # keep padded bf16 logits (no XLA un-pad copy); kernel 2 un-pads on the fly
    return logits_p, pred_p[:M, 0]


# ---------------------------------------------------------------------------
# Kernel 2: fused  error-weight multiply + vocab un-pad + (B,S,V) reshape + f32
#   grid = (B [parallel], S tiles [parallel]); reads padded bf16, writes final f32
# ---------------------------------------------------------------------------
def _weight_unpad_kernel(logits_ref, ew_ref, out_ref):
    V = out_ref.shape[-1]
    prod = logits_ref[...].astype(jnp.float32) * ew_ref[0]      # (ts, V_pad)
    out_ref[0] = prod[:, :V]                                    # drop vocab padding at the store


def _k2_vmem_est(ts, V, V_pad):
    return 2 * ts * V_pad * 2 + 2 * V_pad * 4 + 2 * ts * V * 4


def _pick_ts(S, V, V_pad, budget=24 << 20):
    if S <= 64:
        return S
    for cand in (64, 32, 16, 8):
        if S % cand == 0 and _k2_vmem_est(cand, V, V_pad) <= budget:
            return cand
    return 8 if S % 8 == 0 else S


def _apply_error_weight(logits_pad, error_weight, B, S, V, V_pad):
    ts = _pick_ts(S, V, V_pad)
    if ts % 8 != 0:
        # awkward sequence lengths: plain-XLA epilogue (rare; demo/real S are fine)
        logits = logits_pad[:B * S, :V].astype(jnp.float32).reshape(B, S, V)
        return logits * error_weight[:, None, :]

    ew_p = error_weight
    if V_pad > V:
        ew_p = jnp.zeros((B, V_pad), jnp.float32).at[:, :V].set(error_weight)
    ew_p = ew_p.reshape(B, 1, V_pad)

    vmem_limit = int(min(max(_k2_vmem_est(ts, V, V_pad) + (8 << 20), 32 << 20), 48 << 20))
    n_s = S // ts

    grid_spec = pltpu.PrefetchScalarGridSpec(
        num_scalar_prefetch=0,
        grid=(B, n_s),
        in_specs=[
            pl.BlockSpec((ts, V_pad), lambda b, s: (b * n_s + s, 0)),   # padded bf16 logits rows
            pl.BlockSpec((1, 1, V_pad), lambda b, s: (b, 0, 0)),        # per-batch error weight
        ],
        out_specs=pl.BlockSpec((1, ts, V), lambda b, s: (b, s, 0)),     # final (B, S, V) f32
    )
    return pl.pallas_call(
        _weight_unpad_kernel,
        out_shape=jax.ShapeDtypeStruct((B, S, V), jnp.float32),
        grid_spec=grid_spec,
        compiler_params=pltpu.CompilerParams(
            dimension_semantics=("parallel", "parallel"),
            vmem_limit_bytes=vmem_limit),
    )(logits_pad, ew_p)


# ---------------------------------------------------------------------------
# Host-side pieces
# ---------------------------------------------------------------------------
def cal_error_weight(pred_ids, input_ids, vocab_size):
    # TODO(synk): the confusion-set probability boost needs sighan_all.json and the
    # BERT tokenizer (host-side dict lookups); only the np.ones(vocab) base mask of
    # cal_error_weight is reproduced here.
    del input_ids
    bs = pred_ids.shape[0]
    return jnp.ones((bs, vocab_size), jnp.float32)


def correction_network_forward(bert_hidden, detect_hidden, dense_params, input_ids):
    B, S, H = bert_hidden.shape
    V, V_pad = dense_params["V"], dense_params["V_pad"]
    # hoist the hidden add once and flatten batch*seq into the matmul M axis
    h = (bert_hidden + detect_hidden).reshape(B * S, H)
    logits_pad, pred_flat = _dense_logits_argmax(h, dense_params)
    pred_ids = pred_flat.reshape(B, S)
    error_weight = cal_error_weight(pred_ids, input_ids, V)     # stub: all ones
    out = _apply_error_weight(logits_pad, error_weight, B, S, V, V_pad)
    return out, pred_ids


if __name__ == "__main__":
    B, S, H, V = 2, 8, 32, 300   # small stand-ins for (bs, 128, 768, 23236)
    key = jax.random.PRNGKey(0)
    k1, k2, k3, k4, k5 = jax.random.split(key, 5)

    # Synthetic stand-in for the ChineseBERT encoder's last_hidden_state
    # (tokenizer + pinyin ids + BERT are host-side and not translated).
    bert_hidden = jax.random.normal(k1, (B, S, H), jnp.float32)
    detect_hidden = jax.random.normal(k2, (B, S, H), jnp.float32)
    dense_w = jax.random.normal(k3, (H, V), jnp.float32) / jnp.sqrt(H)
    dense_b = 0.01 * jax.random.normal(k4, (V,), jnp.float32)
    input_ids = jax.random.randint(k5, (B, S), 0, V, dtype=jnp.int32)

    # init-time weight retiling (hoisted out of the per-forward hot path)
    dense_params = prepare_dense_params(dense_w, dense_b)

    out, pred_ids = correction_network_forward(
        bert_hidden, detect_hidden, dense_params, input_ids)
    jax.block_until_ready(out)
    jax.block_until_ready(pred_ids)

    # plain-JAX reference (same bf16 matmul with f32 accumulation + bf16 logits storage)
    h_ref = (bert_hidden + detect_hidden).astype(jnp.bfloat16)
    ref_logits = jnp.einsum("bsh,hv->bsv", h_ref, dense_w.astype(jnp.bfloat16),
                            preferred_element_type=jnp.float32) + dense_b
    ref_pred = jnp.argmax(ref_logits, axis=-1).astype(jnp.int32)
    ref_out = ref_logits.astype(jnp.bfloat16).astype(jnp.float32) \
        * jnp.ones((B, 1, V), jnp.float32)
    assert jnp.allclose(out, ref_out, atol=2e-2, rtol=2e-2), \
        float(jnp.max(jnp.abs(out - ref_out)))
    assert jnp.array_equal(pred_ids, ref_pred)

    print("KERNEL_OK")
</pallas_src>

<mosaic_0001>
module attributes {stable_mosaic.version = 11 : i64} {
  func.func @_logits_argmax_kernel(%arg0: i32, %arg1: i32, %arg2: memref<16x32xbf16, #tpu.memory_space<vmem>>, %arg3: memref<1x32x384xbf16, #tpu.memory_space<vmem>>, %arg4: memref<1x384xf32, #tpu.memory_space<vmem>>, %arg5: memref<16x384xbf16, #tpu.memory_space<vmem>>, %arg6: memref<16x1xi32, #tpu.memory_space<vmem>>, %arg7: memref<16x1xf32, #tpu.memory_space<vmem>>, %arg8: memref<16x1xi32, #tpu.memory_space<vmem>>) attributes {dimension_semantics = [#tpu.dimension_semantics<parallel>, #tpu.dimension_semantics<arbitrary>], iteration_bounds = array<i64: 1, 1>, scalar_prefetch = 0 : i64, scratch_operands = 2 : i64, tpu.core_type = #tpu.core_type<tc>, window_params = [{transform_indices = @transform_0, window_bounds = array<i64: 16, 32>}, {transform_indices = @transform_1, window_bounds = array<i64: 1, 32, 384>}, {transform_indices = @transform_2, window_bounds = array<i64: 1, 384>}, {transform_indices = @transform_3, window_bounds = array<i64: 16, 384>}, {transform_indices = @transform_4, window_bounds = array<i64: 16, 1>}]} {
    %c0 = arith.constant 0 : index
    %c0_0 = arith.constant 0 : index
    %0 = vector.load %arg2[%c0, %c0_0] : memref<16x32xbf16, #tpu.memory_space<vmem>>, vector<16x32xbf16>
    %c0_1 = arith.constant 0 : index
    %c0_2 = arith.constant 0 : index
    %c0_3 = arith.constant 0 : index
    %1 = vector.load %arg3[%c0_1, %c0_2, %c0_3] : memref<1x32x384xbf16, #tpu.memory_space<vmem>>, vector<1x32x384xbf16>
    %2 = vector.shape_cast %1 : vector<1x32x384xbf16> to vector<32x384xbf16>
    %cst = arith.constant dense<0.000000e+00> : vector<16x384xf32>
    %3 = tpu.matmul %0, %2, %cst {dimension_numbers = #tpu.dot_dimension_numbers<[1], [0], [0], [1], [0, 0, 1, 1], [], []>} : vector<16x32xbf16>, vector<32x384xbf16>, vector<16x384xf32> -> vector<16x384xf32>
    %c0_4 = arith.constant 0 : index
    %c0_5 = arith.constant 0 : index
    %4 = vector.load %arg4[%c0_4, %c0_5] : memref<1x384xf32, #tpu.memory_space<vmem>>, vector<1x384xf32>
    %5 = vector.broadcast %4 : vector<1x384xf32> to vector<16x384xf32>
    %6 = arith.addf %3, %5 : vector<16x384xf32>
    %7 = arith.truncf %6 : vector<16x384xf32> to vector<16x384xbf16>
    %c0_6 = arith.constant 0 : index
    %c0_7 = arith.constant 0 : index
    %8 = vector.load %arg5[%c0_6, %c0_7] : memref<16x384xbf16, #tpu.memory_space<vmem>>, vector<16x384xbf16>
    tpu.vector_store %arg5[%c0_6, %c0_7], %7 {strides = array<i32>} : memref<16x384xbf16, #tpu.memory_space<vmem>>, vector<16x384xbf16>,
    %c0_i32 = arith.constant 0 : i32
    %9 = arith.cmpi eq, %arg1, %c0_i32 : i32
    %10 = arith.extui %9 : i1 to i32
    %c0_i32_8 = arith.constant 0 : i32
    %11 = arith.cmpi ne, %10, %c0_i32_8 : i32
    scf.if %11 {
      %cst_23 = arith.constant 0xFF800000 : f32
      %35 = vector.broadcast %cst_23 : f32 to vector<16x1xf32>
      %c0_24 = arith.constant 0 : index
      %c0_25 = arith.constant 0 : index
      %36 = vector.load %arg7[%c0_24, %c0_25] : memref<16x1xf32, #tpu.memory_space<vmem>>, vector<16x1xf32>
      tpu.vector_store %arg7[%c0_24, %c0_25], %35 {strides = array<i32>} : memref<16x1xf32, #tpu.memory_space<vmem>>, vector<16x1xf32>,
      %c0_i32_26 = arith.constant 0 : i32
      %37 = vector.broadcast %c0_i32_26 : i32 to vector<16x1xi32>
      %c0_27 = arith.constant 0 : index
      %c0_28 = arith.constant 0 : index
      %38 = vector.load %arg8[%c0_27, %c0_28] : memref<16x1xi32, #tpu.memory_space<vmem>>, vector<16x1xi32>
      tpu.vector_store %arg8[%c0_27, %c0_28], %37 {strides = array<i32>} : memref<16x1xi32, #tpu.memory_space<vmem>>, vector<16x1xi32>,
    } else {
    }
    %cst_9 = arith.constant dense<0xFF800000> : vector<16xf32>
    %12 = vector.multi_reduction <maximumf>, %6, %cst_9 [1] : vector<16x384xf32> to vector<16xf32>
    %13 = vector.shape_cast %12 : vector<16xf32> to vector<16x1xf32>
    %14 = tpu.iota {dimensions = array<i32: 1>} : vector<16x384xi32>
    %15 = vector.broadcast %13 : vector<16x1xf32> to vector<16x384xf32>
    %16 = arith.cmpf oeq, %6, %15 : vector<16x384xf32>
    %c2147483647_i32 = arith.constant 2147483647 : i32
    %17 = vector.broadcast %c2147483647_i32 : i32 to vector<16x384xi32>
    %18 = arith.select %16, %14, %17 : vector<16x384xi1>, vector<16x384xi32>
    %cst_10 = arith.constant dense<2147483647> : vector<16xi32>
    %19 = vector.multi_reduction <minsi>, %18, %cst_10 [1] : vector<16x384xi32> to vector<16xi32>
    %20 = vector.shape_cast %19 : vector<16xi32> to vector<16x1xi32>
    %c384_i32 = arith.constant 384 : i32
    %21 = arith.muli %arg1, %c384_i32 : i32
    %22 = vector.broadcast %21 : i32 to vector<16x1xi32>
    %23 = arith.addi %20, %22 : vector<16x1xi32>
    %c0_11 = arith.constant 0 : index
    %c0_12 = arith.constant 0 : index
    %24 = vector.load %arg7[%c0_11, %c0_12] : memref<16x1xf32, #tpu.memory_space<vmem>>, vector<16x1xf32>
    %25 = arith.cmpf ogt, %13, %24 : vector<16x1xf32>
    %c0_13 = arith.constant 0 : index
    %c0_14 = arith.constant 0 : index
    %26 = vector.load %arg8[%c0_13, %c0_14] : memref<16x1xi32, #tpu.memory_space<vmem>>, vector<16x1xi32>
    %27 = arith.select %25, %23, %26 : vector<16x1xi1>, vector<16x1xi32>
    %c0_15 = arith.constant 0 : index
    %c0_16 = arith.constant 0 : index
    %28 = vector.load %arg8[%c0_15, %c0_16] : memref<16x1xi32, #tpu.memory_space<vmem>>, vector<16x1xi32>
    tpu.vector_store %arg8[%c0_15, %c0_16], %27 {strides = array<i32>} : memref<16x1xi32, #tpu.memory_space<vmem>>, vector<16x1xi32>,
    %c0_17 = arith.constant 0 : index
    %c0_18 = arith.constant 0 : index
    %29 = vector.load %arg7[%c0_17, %c0_18] : memref<16x1xf32, #tpu.memory_space<vmem>>, vector<16x1xf32>
    %30 = arith.select %25, %13, %29 : vector<16x1xi1>, vector<16x1xf32>
    %c0_19 = arith.constant 0 : index
    %c0_20 = arith.constant 0 : index
    %31 = vector.load %arg7[%c0_19, %c0_20] : memref<16x1xf32, #tpu.memory_space<vmem>>, vector<16x1xf32>
    tpu.vector_store %arg7[%c0_19, %c0_20], %30 {strides = array<i32>} : memref<16x1xf32, #tpu.memory_space<vmem>>, vector<16x1xf32>,
    %c0_i32_21 = arith.constant 0 : i32
    %32 = arith.cmpi eq, %arg1, %c0_i32_21 : i32
    %33 = arith.extui %32 : i1 to i32
    %c0_i32_22 = arith.constant 0 : i32
    %34 = arith.cmpi ne, %33, %c0_i32_22 : i32
    scf.if %34 {
      %c0_23 = arith.constant 0 : index
      %c0_24 = arith.constant 0 : index
      %35 = vector.load %arg8[%c0_23, %c0_24] : memref<16x1xi32, #tpu.memory_space<vmem>>, vector<16x1xi32>
      %c0_25 = arith.constant 0 : index
      %c0_26 = arith.constant 0 : index
      %36 = vector.load %arg6[%c0_25, %c0_26] : memref<16x1xi32, #tpu.memory_space<vmem>>, vector<16x1xi32>
      tpu.vector_store %arg6[%c0_25, %c0_26], %35 {strides = array<i32>} : memref<16x1xi32, #tpu.memory_space<vmem>>, vector<16x1xi32>,
    } else {
    }
    return
  }
  func.func @transform_0(%arg0: i32, %arg1: i32) -> (i32, i32) {
    %c0_i32 = arith.constant 0 : i32
    %c0_i32_0 = arith.constant 0 : i32
    return %arg0, %c0_i32 : i32, i32
  }
  func.func @transform_1(%arg0: i32, %arg1: i32) -> (i32, i32, i32) {
    %c0_i32 = arith.constant 0 : i32
    %c0_i32_0 = arith.constant 0 : i32
    %c0_i32_1 = arith.constant 0 : i32
    return %arg1, %c0_i32, %c0_i32_0 : i32, i32, i32
  }
  func.func @transform_2(%arg0: i32, %arg1: i32) -> (i32, i32) {
    %c0_i32 = arith.constant 0 : i32
    %c0_i32_0 = arith.constant 0 : i32
    return %c0_i32, %arg1 : i32, i32
  }
  func.func @transform_3(%arg0: i32, %arg1: i32) -> (i32, i32) {
    %c0_i32 = arith.constant 0 : i32
    return %arg0, %arg1 : i32, i32
  }
  func.func @transform_4(%arg0: i32, %arg1: i32) -> (i32, i32) {
    %c0_i32 = arith.constant 0 : i32
    %c0_i32_0 = arith.constant 0 : i32
    return %arg0, %c0_i32 : i32, i32
  }
}

</mosaic_0001>

<bundles_post_ra>
// kernel: tpu_custom_call.1
= control target key start
LH: loop header
LB: loop body
LE: loop exit
PB: predicated region body
PF: predicated region fallthrough
CT: control target
= control target key end

     0   :  { %10 = vsyncpa [#allocation5], 0  ;;  %s559_s0 = inlined_call_operand.hbm [shape: bf16[16,32], index: 0, kind: input, shape index: {}]   ;;  %s560_s1 = inlined_call_operand.hbm [shape: bf16[1,32,384], index: 1, kind: input, shape index: {}]   ;;  %s561_s2 = inlined_call_operand.vmem [shape: f32[1,384], index: 2, kind: input, shape index: {}]   ;;  %s562_s3 = inlined_call_operand.hbm [shape: bf16[16,384], index: 3, kind: output, shape index: {0}]   ;;  %s563_s4 = inlined_call_operand.vmem [shape: s32[16,1], index: 4, kind: output, shape index: {1}]  }
   0x1   :  { %11 = vsyncpa [#allocation8], 0 }
   0x2   :  { %12 = vsyncpa [#allocation6], 0  ;;  %s455_s15 = smov [#allocation4]  }
   0x3   :  { %s18_s16 = sshll.u32 %s455_s15, 4  ;;  %s19_s16 = int_to_ptr.vmem [resolvable:$true] %s18_s16 }
   0x4   :  { %s397_s17 = scalar_lea.vmem %s19_s16, 128  ;;  %p402_p1 = scmp.lt.s32.totalorder %s19_s16, %s19_s16 }
   0x5   :  { %p398_p0 = scmp.ne.s32.totalorder %s19_s16, %s397_s17  ;;  %p403_p2 = scmp.lt.s32.totalorder %s397_s17, %s397_s17 }
   0x7   :  { %p404_p3 = por %p403_p2, %p402_p1 }
   0x9   :  { %p405_p4 = pnand %p404_p3, %p398_p0 }
   0xb   :  { %408 = shalt.err (!%p405_p4)
}
   0xc   :  { %s456_s18 = smov 64   ;;  %s457_s19 = smov 4  }
   0xd   :  { %24 = dma.hbm_to_vmem [thread:$0]  %s559_s0, 128, %s19_s16, [#allocation5], %s456_s18, %s456_s18, %s457_s19  }
   0xe   :  { %s458_s22 = smov [#allocation7]  }
   0xf   :  { %s30_s23 = sshll.u32 %s458_s22, 4  ;;  %s31_s23 = int_to_ptr.vmem [resolvable:$true] %s30_s23 }
  0x10   :  { %s417_s24 = scalar_lea.vmem %s31_s23, 768  ;;  %p422_p6 = scmp.lt.s32.totalorder %s31_s23, %s31_s23 }
  0x11   :  { %p418_p5 = scmp.ne.s32.totalorder %s31_s23, %s417_s24  ;;  %p423_p7 = scmp.lt.s32.totalorder %s417_s24, %s417_s24 }
  0x13   :  { %p424_p8 = por %p423_p7, %p422_p6 }
  0x15   :  { %p425_p9 = pnand %p424_p8, %p418_p5 }
  0x17   :  { %428 = shalt.err (!%p425_p9)
}
  0x18   :  { %s459_s25 = smov 192   ;;  %s460_s26 = smov 12  }
  0x19   :  { %36 = dma.hbm_to_vmem [thread:$0]  %s560_s1, 768, %s31_s23, [#allocation8], %s459_s25, %s459_s25, %s460_s26  }
  0x1a   :  { %449 = dma.done.wait [#allocation5], 128  }
  0x1b   :  { %450 = vsyncadd [#allocation5], 4294967168 }
  0x1c   :  { %451 = dma.done.wait [#allocation8], 768  }
  0x1d   :  { %452 = vsyncadd [#allocation8], 4294966528  ;;  %vm226_vm0 = vcmask 7168   ;;  %v461_v0 = vmov 0.0   ;;  %vm462_vm1 = vmmov 0   ;;  %v463_v1 = vmov 0  }
  0x1e   :  { %361 = vmatprep.subr.bf16.mxu1 %v461_v0  ;;  %365 = vmatprep.mubr.msk.bf16.mxu1 %vm462_vm1, %v461_v0  ;;  %229 = vst.msk [vmem:[#allocation3] sm:$0xff] %vm226_vm0, %v463_v1  ;;  %230 = vst.msk [vmem:[#allocation3 + $0x8] sm:$0xff] %vm226_vm0, %v463_v1  ;;  %v380_v2 = vld [vmem:[#allocation7 + $0x1c] ss:$12 sps:$4 sm:$0xff]   ;;  %v382_v3 = vld [vmem:[#allocation7 + $0x20] ss:$12 sps:$4 sm:$0xff]   ;;  %v58_v10 = vlaneseq }
  0x1f   :  { %146 = vmatprep.mubr.bf16.mxu0 %v463_v1  ;;  %126 = vmatprep.subr.bf16.mxu0 %v380_v2  ;;  %v383_v4 = vld [vmem:[#allocation7 + $0x18] ss:$12 sps:$4 sm:$0xff]   ;;  %v386_v6 = vld [vmem:[#allocation7 + $0x8] ss:$12 sps:$4 sm:$0xff]   ;;  %v387_v7 = vld [vmem:[#allocation7] ss:$12 sps:$4 sm:$0xff]  }
  0x20   :  { %362 = vmatpush3.bf16.msra.mxu1 %v382_v3  ;;  %v384_v5 = vld [vmem:[#allocation7 + $0x4] ss:$12 sps:$4 sm:$0xff]   ;;  %127 = vmatpush1.bf16.msra.mxu0 %v383_v4  ;;  %v388_v8 = vld [vmem:[#allocation4] sm:$0xff]   ;;  %vm110_vm2 = vcmask 261120   ;;  %v464_v9 = vmov -inf   ;;  %v59_v11 = vshrl.u32 %v58_v10, 7 }
  0x21   :  { %363 = vmatprep.subr.bf16.mxu1 %v461_v0  ;;  %128 = vmatprep.subr.bf16.mxu0 %v384_v5  ;;  %227 = vst.msk [vmem:[#allocation2] sm:$0xff] %vm226_vm0, %v464_v9  ;;  %228 = vst.msk [vmem:[#allocation2 + $0x8] sm:$0xff] %vm226_vm0, %v464_v9  ;;  %v56_v13 = vld [vmem:[%s561_s2] sm:$0x7]  ;;  %v240_v41 = vand.u32 127, %v58_v10  ;;  %s465_s2 = smov [#allocation9]  }
  0x22   :  { %v68_v12 = vsub.s32 2, %v59_v11  ;;  %v60_v14 = vsub.s32 0, %v59_v11  ;;  %v64_v15 = vsub.s32 1, %v59_v11  ;;  %s324_s29 = sshll.u32 %s465_s2, 4  ;;  %s325_s29 = int_to_ptr.vmem [resolvable:$true] %s324_s29 }
  0x23   :  { %v242_v43 = vadd.s32 256, %v240_v41  ;;  %v241_v45 = vadd.s32 128, %v240_v41  ;;  %s429_s30 = scalar_lea.vmem %s325_s29, 384  ;;  %p434_p11 = scmp.lt.s32.totalorder %s325_s29, %s325_s29 }
  0x24   :  { %364 = vmatpush3.bf16.msra.mxu1 %v386_v6  ;;  %129 = vmatpush1.bf16.msra.mxu0 %v387_v7  ;;  %v69_v16 = vrot.slane %v56_v13, %v68_v12  ;;  %v61_v17 = vrot.slane %v56_v13, %v60_v14  ;;  %v65_v19 = vrot.slane %v56_v13, %v64_v15  ;;  %p430_p10 = scmp.ne.s32.totalorder %s325_s29, %s429_s30  ;;  %p435_p12 = scmp.lt.s32.totalorder %s429_s30, %s429_s30 }
  0x26   :  { %p436_p13 = por %p435_p12, %p434_p11 }
  0x27   :  { %366 = vmatmul.mubr.msk.bf16.vlgmr.msra.gmra.mxu1 %vm110_vm2, %v388_v8  ;;  %348 = vmatmul.mubr.msk.bf16.vlgmr.msra.gmra.mxu0 %vm110_vm2, %v388_v8 }
  0x28   :  { %v507_v42 = vld [vmem:[#allocation2] sm:$0xff]  ;;  %v521_v47 = vld [vmem:[#allocation2 + $0x8] sm:$0xff]  ;;  %p437_p0 = pnand %p436_p13, %p430_p10 }
  0xe7   :  { %v191_v18 = vpop.f32.mrf.mxu1  ;;  %v148_v21 = vpop.f32.mrf.mxu0 }
  0xe8   :  { %v192_v20 = vadd.f32 %v191_v18, %v69_v16  ;;  %v149_v22 = vadd.f32 %v148_v21, %v61_v17 }
  0xe9   :  { %v367_v23 = vpop.f32.mrf.mxu1  ;;  %v150_v25 = vpop.f32.mrf.mxu0 }
  0xea   :  { %v355_v24 = vpack.c.bf16 %v192_v20, %v192_v20  ;;  %v151_v26 = vadd.f32 %v150_v25, %v65_v19  ;;  %v231_v28 = vmax.f32 %v149_v22, %v192_v20 }
  0xeb   :  { %v194_v27 = vpop.f32.mrf.mxu1  ;;  %v152_v30 = vpop.f32.mrf.mxu0 }
  0xec   :  { %219 = vst [vmem:[#allocation9 + $0x8] sm:$0xf] %v355_v24  ;;  %v195_v29 = vadd.f32 %v194_v27, %v69_v16  ;;  %v354_v31 = vpack.c.bf16 %v151_v26, %v149_v22  ;;  %v153_v32 = vadd.f32 %v152_v30, %v61_v17  ;;  %v232_v34 = vmax.f32 %v231_v28, %v151_v26 }
  0xed   :  { %v368_v33 = vpop.f32.mrf.mxu1  ;;  %v154_v36 = vpop.f32.mrf.mxu0 }
  0xee   :  { %v357_v35 = vpack.c.bf16 %v195_v29, %v195_v29  ;;  %218 = vst [vmem:[#allocation9] sm:$0xff] %v354_v31  ;;  %v155_v37 = vadd.f32 %v154_v36, %v65_v19  ;;  %233 = vmax.xlane.f32.xlu0 %v232_v34  ;;  %v235_v38 = vmax.f32 %v153_v32, %v195_v29 }
  0xf0   :  { %221 = vst [vmem:[#allocation9 + $0x14] sm:$0xf] %v357_v35  ;;  %v356_v39 = vpack.c.bf16 %v155_v37, %v153_v32  ;;  %v236_v40 = vmax.f32 %v235_v38, %v155_v37 }
  0xf2   :  { %220 = vst [vmem:[#allocation9 + $0xc] sm:$0xff] %v356_v39  ;;  %237 = vmax.xlane.f32.xlu0 %v236_v40 }
 0x177   :  { %v509_v44 = vpop.xlane.xlu0 %233 }
 0x178   :  { %vm297_vm3 = vcmp.gt.f32.partialorder %v509_v44, %v507_v42  ;;  %vm243_vm4 = vcmp.eq.f32.partialorder %v149_v22, %v509_v44  ;;  %vm244_vm5 = vcmp.eq.f32.partialorder %v151_v26, %v509_v44  ;;  %vm245_vm6 = vcmp.eq.f32.partialorder %v192_v20, %v509_v44 }
 0x179   :  { %v308_v46 = vsel %vm297_vm3, %v509_v44, %v507_v42  ;;  %v249_v48 = vsel %vm243_vm4, %v240_v41, 2147483647  ;;  %v251_v49 = vsel %vm245_vm6, %v242_v43, 2147483647  ;;  %v250_v51 = vsel %vm244_vm5, %v241_v45, 2147483647 }
 0x17a   :  { %310 = vst.msk [vmem:[#allocation2] sm:$0xff] %vm226_vm0, %v308_v46  ;;  %vm255_vm7 = vcmp.lt.s32.totalorder %v249_v48, %v251_v49 }
 0x17b   :  { %v524_v50 = vpop.xlane.xlu0 %237  ;;  %v256_v52 = vsel %vm255_vm7, %v249_v48, %v251_v49 }
 0x17c   :  { %vm298_vm8 = vcmp.gt.f32.partialorder %v524_v50, %v521_v47  ;;  %vm257_vm9 = vcmp.lt.s32.totalorder %v256_v52, %v250_v51  ;;  %vm246_vm10 = vcmp.eq.f32.partialorder %v153_v32, %v524_v50  ;;  %vm247_vm11 = vcmp.eq.f32.partialorder %v155_v37, %v524_v50 }
 0x17d   :  { %v309_v53 = vsel %vm298_vm8, %v524_v50, %v521_v47  ;;  %v258_v54 = vsel %vm257_vm9, %v256_v52, %v250_v51  ;;  %vm248_vm12 = vcmp.eq.f32.partialorder %v195_v29, %v524_v50  ;;  %v252_v55 = vsel %vm246_vm10, %v240_v41, 2147483647 }
 0x17e   :  { %311 = vst.msk [vmem:[#allocation2 + $0x8] sm:$0xff] %vm226_vm0, %v309_v53  ;;  %v260_v56 = vshra.s32 %v258_v54, 16  ;;  %v254_v57 = vsel %vm248_vm12, %v242_v43, 2147483647  ;;  %v253_v59 = vsel %vm247_vm11, %v241_v45, 2147483647 }
 0x17f   :  { %vm273_vm13 = vcmp.lt.s32.totalorder %v252_v55, %v254_v57  ;;  %v259_v0 = vand.u32 65535, %v258_v54 }
 0x180   :  { %v262_v58 = vcvt.s32.f32 %v260_v56  ;;  %v274_v60 = vsel %vm273_vm13, %v252_v55, %v254_v57 }
 0x181   :  { %vm275_vm14 = vcmp.lt.s32.totalorder %v274_v60, %v253_v59  ;;  %v261_v2 = vcvt.s32.f32 %v259_v0 }
 0x182   :  { %263 = vmin.xlane.f32.xlu1 %v262_v58  ;;  %v276_v61 = vsel %vm275_vm14, %v274_v60, %v253_v59 }
 0x183   :  { %v278_v62 = vshra.s32 %v276_v61, 16  ;;  %v277_v3 = vand.u32 65535, %v276_v61 }
 0x185   :  { %v280_v63 = vcvt.s32.f32 %v278_v62  ;;  %v279_v6 = vcvt.s32.f32 %v277_v3 }
 0x187   :  { %281 = vmin.xlane.f32.xlu1 %v280_v63 }
 0x20b   :  { %v264_v1 = vpop.xlane.xlu1 %263 }
 0x20c   :  { %vm265_vm15 = vcmp.eq.f32.partialorder %v262_v58, %v264_v1 }
 0x20d   :  { %v266_v4 = vsel %vm265_vm15, %v261_v2, inf }
 0x20e   :  { %267 = vmin.xlane.f32.xlu0 %v266_v4 }
 0x210   :  { %v282_v5 = vpop.xlane.xlu1 %281 }
 0x211   :  { %vm283_vm1 = vcmp.eq.f32.partialorder %v280_v63, %v282_v5 }
 0x212   :  { %v284_v7 = vsel %vm283_vm1, %v279_v6, inf }
 0x213   :  { %285 = vmin.xlane.f32.xlu1 %v284_v7 }
 0x214   :  { %440 = shalt.err (!%p437_p0)
}
 0x215   :  { %330 = dma.vmem_to_hbm [thread:$0]  %s325_s29, 384, %s562_s3, [#allocation6], %s459_s25, %s459_s25, %s460_s26   ;;  %v270_v8 = vcvt.f32.s32 %v264_v1  ;;  %v288_v12 = vcvt.f32.s32 %v282_v5  ;;  %v299_v13 = vld [vmem:[#allocation3] sm:$0xff]  ;;  %v300_v19 = vld [vmem:[#allocation3 + $0x8] sm:$0xff] }
 0x217   :  { %v271_v10 = vshll.u32 %v270_v8, 16  ;;  %v289_v17 = vshll.u32 %v288_v12, 16 }
 0x297   :  { %v268_v9 = vpop.xlane.xlu0 %267 }
 0x298   :  { %v269_v11 = vcvt.f32.s32 %v268_v9 }
 0x29a   :  { %v272_v14 = vadd.s32 %v271_v10, %v269_v11 }
 0x29c   :  { %v301_v15 = vsel %vm297_vm3, %v272_v14, %v299_v13  ;;  %v286_v16 = vpop.xlane.xlu1 %285 }
 0x29d   :  { %304 = vst.msk [vmem:[#allocation3] sm:$0xff] %vm226_vm0, %v301_v15  ;;  %v287_v18 = vcvt.f32.s32 %v286_v16 }
 0x29f   :  { %v290_v20 = vadd.s32 %v289_v17, %v287_v18 }
 0x2a1   :  { %v302_v21 = vsel %vm298_vm8, %v290_v20, %v300_v19 }
 0x2a2   :  { %305 = vst.msk [vmem:[#allocation3 + $0x8] sm:$0xff] %vm226_vm0, %v302_v21 }
 0x2a4   :  { %v315_v22 = vld [vmem:[#allocation3] sm:$0xff] }
 0x2a5   :  { %317 = vst.msk [vmem:[%s563_s4] sm:$0xff] %vm226_vm0, %v315_v22 }
 0x2a9   :  { %v316_v23 = vld [vmem:[#allocation3 + $0x8] sm:$0xff] }
 0x2aa   :  { %318 = vst.msk [vmem:[%s563_s4 + $0x8] sm:$0xff] %vm226_vm0, %v316_v23 }
 0x2ab   :  { %453 = dma.done.wait [#allocation6], 384  }
 0x2ac   :  { %454 = vsyncadd [#allocation6], 4294966912 }
 0x2ad   :  { %338 = vsyncpa [#allocation5], 1 }
 0x2ae   :  { %339 = vsyncpa [#allocation8], 1 }
 0x2af   :  { %340 = vsyncpa [#allocation6], 1 }

</bundles_post_ra>
